<compile_context>
chip_gen: v6e
topology: v6e:2x2x1
jax: 0.10.0
libtpu: 0.0.40
codegen_flags: <defaults>
</compile_context>

<pallas_src>
import functools

import jax
import jax.numpy as jnp
from jax import lax
from jax.experimental import pallas as pl
from jax.experimental.pallas import tpu as pltpu


def _tad_lstm_kernel(lens_ref, pre_ref, w_hh_ref, w1_ref, b1_ref, w2_ref, b2_ref,
                     sent_ref, adv_ref,
                     h_scr, c_scr, *, time_block):
    """Sequential LSTM recurrence over a block of `time_block` timesteps.

    Grid = (batch_blocks [parallel], time_blocks [arbitrary]).
    pre_ref : [TB, 4, BB, H] f32  precomputed x@W_ih + b, gate-major
    w_hh_ref: [4, H, H]      bf16 recurrent weights, gate-major
    """
    s = pl.program_id(1)                       # time-block index (sequential axis)

    @pl.when(s == 0)
    def _():
        h_scr[...] = jnp.zeros_like(h_scr)
        c_scr[...] = jnp.zeros_like(c_scr)

    # Hoisted out of the inner timestep loop (loaded once per grid step).
    lens = lens_ref[...]                       # [BB, 1] int32
    t0 = s * time_block
    w_i = w_hh_ref[0]                          # [H, H] bf16
    w_f = w_hh_ref[1]
    w_g = w_hh_ref[2]
    w_o = w_hh_ref[3]

    def step(tt, carry):
        h, c = carry                           # f32 [BB, H]
        h_b = h.astype(jnp.bfloat16)
        pre = pre_ref[tt]                      # [4, BB, H] f32 (leading-axis index only)
        i_g = jax.nn.sigmoid(pre[0] + jnp.dot(h_b, w_i, preferred_element_type=jnp.float32))
        f_g = jax.nn.sigmoid(pre[1] + jnp.dot(h_b, w_f, preferred_element_type=jnp.float32))
        g_g = jnp.tanh(      pre[2] + jnp.dot(h_b, w_g, preferred_element_type=jnp.float32))
        o_g = jax.nn.sigmoid(pre[3] + jnp.dot(h_b, w_o, preferred_element_type=jnp.float32))
        c_new = f_g * c + i_g * g_g
        h_new = o_g * jnp.tanh(c_new)
        # packed-sequence semantics: only advance state while global_t < length
        upd = (t0 + tt) < lens                 # [BB, 1] bool
        return jnp.where(upd, h_new, h), jnp.where(upd, c_new, c)

    h_fin, c_fin = lax.fori_loop(0, time_block, step,
                                 (h_scr[...], c_scr[...]), unroll=True)
    h_scr[...] = h_fin
    c_scr[...] = c_fin

    @pl.when(s == pl.num_programs(1) - 1)
    def _():
        hf = h_fin.astype(jnp.bfloat16)        # == h_n[0] for this batch block
        sent_ref[...] = (jnp.dot(hf, w1_ref[...], preferred_element_type=jnp.float32)
                         + b1_ref[...])
        adv_ref[...] = (jnp.dot(hf, w2_ref[...], preferred_element_type=jnp.float32)
                        + b2_ref[...])


def tad_lstm_forward(text_indices, embedding_matrix, params, *,
                     time_block=32, batch_block=None):
    """text_indices: [B, T] int32. Returns (sent_logits, advdet_logits, adv_tr_logits)."""
    w_ih, w_hh, b_lstm, w1, b1, w2, b2 = params
    B, T = text_indices.shape
    E = embedding_matrix.shape[1]
    H = w_hh.shape[0]
    C = w1.shape[1]

    # --- padding: batch to a multiple of 8 sublanes, time to a multiple of TB ---
    TB = min(time_block, T)
    T_pad = pl.cdiv(T, TB) * TB
    B_pad = pl.cdiv(B, 8) * 8
    BB = batch_block if batch_block is not None else B_pad
    assert B_pad % BB == 0

    idx = jnp.pad(text_indices, ((0, B_pad - B), (0, T_pad - T)))      # pad rows -> len 0
    lens = jnp.sum(idx != 0, axis=-1).astype(jnp.int32)[:, None]        # [B_pad, 1]

    # --- hoisted, time-independent work (runs as big parallel XLA ops) ---
    # embedding gather + one large bf16 matmul for the input projection.
    x = jnp.take(embedding_matrix, idx, axis=0).astype(jnp.bfloat16)    # [B_pad, T_pad, E]
    w_ih_g = w_ih.reshape(E, 4, H).astype(jnp.bfloat16)                 # gate-major
    gates_pre = jnp.einsum('bte,egh->tgbh', x, w_ih_g,
                           preferred_element_type=jnp.float32)          # [T_pad, 4, B_pad, H]
    gates_pre = gates_pre + b_lstm.reshape(1, 4, 1, H)

    w_hh_g = jnp.transpose(w_hh.reshape(H, 4, H), (1, 0, 2)).astype(jnp.bfloat16)  # [4,H,H]
    w1_b = w1.astype(jnp.bfloat16)
    w2_b = w2.astype(jnp.bfloat16)

    grid = (B_pad // BB, T_pad // TB)
    kernel = functools.partial(_tad_lstm_kernel, time_block=TB)

    grid_spec = pltpu.PrefetchScalarGridSpec(
        num_scalar_prefetch=0,
        grid=grid,
        in_specs=[
            pl.BlockSpec((BB, 1), lambda b, s: (b, 0)),              # lens
            pl.BlockSpec((TB, 4, BB, H), lambda b, s: (s, 0, b, 0)),  # gates_pre block
            pl.BlockSpec((4, H, H), lambda b, s: (0, 0, 0)),         # W_hh (gate-major, bf16)
            pl.BlockSpec((H, C), lambda b, s: (0, 0)),               # dense1 W^T (bf16)
            pl.BlockSpec((1, C), lambda b, s: (0, 0)),               # dense1 b
            pl.BlockSpec((H, C), lambda b, s: (0, 0)),               # dense2 W^T (bf16)
            pl.BlockSpec((1, C), lambda b, s: (0, 0)),               # dense2 b
        ],
        out_specs=[
            pl.BlockSpec((BB, C), lambda b, s: (b, 0)),              # sent logits
            pl.BlockSpec((BB, C), lambda b, s: (b, 0)),              # advdet (== adv_tr)
        ],
        scratch_shapes=[
            pltpu.VMEM((BB, H), jnp.float32),    # h carry (f32 state)
            pltpu.VMEM((BB, H), jnp.float32),    # c carry (f32 state)
        ],
    )

    # NOTE: for v7x (64 MiB VMEM) keep 2*TB*4*BB*H*4 bytes + weights well under the
    # scoped limit when scaling TB/BB up; defaults are ample at these sizes.
    sent, adv = pl.pallas_call(
        kernel,
        out_shape=(jax.ShapeDtypeStruct((B_pad, C), jnp.float32),
                   jax.ShapeDtypeStruct((B_pad, C), jnp.float32)),
        grid_spec=grid_spec,
        compiler_params=pltpu.CompilerParams(
            dimension_semantics=("parallel", "arbitrary")),
    )(lens, gates_pre, w_hh_g, w1_b, b1, w2_b, b2)

    sent = sent[:B]
    adv = adv[:B]
    return sent, adv, adv        # adv_tr_logits uses the same dense2 layer


def init_params(key, embed_dim, hidden_dim, class_dim):
    ks = jax.random.split(key, 8)
    u = lambda k, shape: jax.random.uniform(k, shape, jnp.float32, -0.1, 0.1)
    w_ih = u(ks[0], (embed_dim, 4 * hidden_dim))      # pre-transposed: x @ W_ih^T
    w_hh = u(ks[1], (hidden_dim, 4 * hidden_dim))     # pre-transposed: h @ W_hh^T
    b_lstm = u(ks[2], (1, 4 * hidden_dim))            # b_ih + b_hh combined (single draw)
    w1 = u(ks[3], (hidden_dim, class_dim))            # dense1
    b1 = u(ks[4], (1, class_dim))
    w2 = u(ks[5], (hidden_dim, class_dim))            # dense2 (shared by advdet & adv_tr)
    b2 = u(ks[6], (1, class_dim))
    return (w_ih, w_hh, b_lstm, w1, b1, w2, b2)


if __name__ == "__main__":
    B, T, E, H, C, VOCAB = 2, 8, 32, 32, 3, 50

    key = jax.random.PRNGKey(0)
    k_emb, k_idx, k_par = jax.random.split(key, 3)

    embedding_matrix = jax.random.normal(k_emb, (VOCAB, E), jnp.float32)
    embedding_matrix = embedding_matrix.at[0].set(0.0)   # padding row

    # deterministic token ids with trailing padding (zeros) -> variable lengths
    text_indices = jax.random.randint(k_idx, (B, T), 1, VOCAB, jnp.int32)
    pos = jnp.arange(T)[None, :]
    lengths = jnp.array([T, T - 3], dtype=jnp.int32)[:, None]
    text_indices = jnp.where(pos < lengths, text_indices, 0)

    params = init_params(k_par, E, H, C)

    fwd = jax.jit(functools.partial(tad_lstm_forward, time_block=4))
    sent_logits, advdet_logits, adv_tr_logits = jax.block_until_ready(
        fwd(text_indices, embedding_matrix, params))

    assert sent_logits.shape == (B, C)
    assert advdet_logits.shape == (B, C)
    assert adv_tr_logits.shape == (B, C)
    print("KERNEL_OK")
</pallas_src>

<mosaic_0001>
module attributes {stable_mosaic.version = 11 : i64} {
  func.func @_tad_lstm_kernel(%arg0: i32, %arg1: i32, %arg2: memref<8x1xi32, #tpu.memory_space<vmem>>, %arg3: memref<4x4x8x32xf32, #tpu.memory_space<vmem>>, %arg4: memref<4x32x32xbf16, #tpu.memory_space<vmem>>, %arg5: memref<32x3xbf16, #tpu.memory_space<vmem>>, %arg6: memref<1x3xf32, #tpu.memory_space<vmem>>, %arg7: memref<32x3xbf16, #tpu.memory_space<vmem>>, %arg8: memref<1x3xf32, #tpu.memory_space<vmem>>, %arg9: memref<8x3xf32, #tpu.memory_space<vmem>>, %arg10: memref<8x3xf32, #tpu.memory_space<vmem>>, %arg11: memref<8x32xf32, #tpu.memory_space<vmem>>, %arg12: memref<8x32xf32, #tpu.memory_space<vmem>>) attributes {dimension_semantics = [#tpu.dimension_semantics<parallel>, #tpu.dimension_semantics<arbitrary>], iteration_bounds = array<i64: 1, 2>, scalar_prefetch = 0 : i64, scratch_operands = 2 : i64, tpu.core_type = #tpu.core_type<tc>, window_params = [{transform_indices = @transform_0, window_bounds = array<i64: 8, 1>}, {transform_indices = @transform_1, window_bounds = array<i64: 4, 4, 8, 32>}, {pipeline_mode = #tpu.pipeline_mode<synchronous>, transform_indices = @transform_2, window_bounds = array<i64: 4, 32, 32>}, {pipeline_mode = #tpu.pipeline_mode<synchronous>, transform_indices = @transform_3, window_bounds = array<i64: 32, 3>}, {pipeline_mode = #tpu.pipeline_mode<synchronous>, transform_indices = @transform_4, window_bounds = array<i64: 1, 3>}, {pipeline_mode = #tpu.pipeline_mode<synchronous>, transform_indices = @transform_5, window_bounds = array<i64: 32, 3>}, {pipeline_mode = #tpu.pipeline_mode<synchronous>, transform_indices = @transform_6, window_bounds = array<i64: 1, 3>}, {transform_indices = @transform_7, window_bounds = array<i64: 8, 3>}, {transform_indices = @transform_8, window_bounds = array<i64: 8, 3>}]} {
    %c0_i32 = arith.constant 0 : i32
    %0 = arith.cmpi eq, %arg1, %c0_i32 : i32
    %1 = arith.extui %0 : i1 to i32
    %c0_i32_0 = arith.constant 0 : i32
    %2 = arith.cmpi ne, %1, %c0_i32_0 : i32
    scf.if %2 {
      %cst_62 = arith.constant 0.000000e+00 : f32
      %220 = vector.broadcast %cst_62 : f32 to vector<8x32xf32>
      %c0_63 = arith.constant 0 : index
      %c0_64 = arith.constant 0 : index
      %221 = vector.load %arg11[%c0_63, %c0_64] : memref<8x32xf32, #tpu.memory_space<vmem>>, vector<8x32xf32>
      tpu.vector_store %arg11[%c0_63, %c0_64], %220 {strides = array<i32>} : memref<8x32xf32, #tpu.memory_space<vmem>>, vector<8x32xf32>,
      %cst_65 = arith.constant 0.000000e+00 : f32
      %222 = vector.broadcast %cst_65 : f32 to vector<8x32xf32>
      %c0_66 = arith.constant 0 : index
      %c0_67 = arith.constant 0 : index
      %223 = vector.load %arg12[%c0_66, %c0_67] : memref<8x32xf32, #tpu.memory_space<vmem>>, vector<8x32xf32>
      tpu.vector_store %arg12[%c0_66, %c0_67], %222 {strides = array<i32>} : memref<8x32xf32, #tpu.memory_space<vmem>>, vector<8x32xf32>,
    } else {
    }
    %c0 = arith.constant 0 : index
    %c0_1 = arith.constant 0 : index
    %3 = vector.load %arg2[%c0, %c0_1] : memref<8x1xi32, #tpu.memory_space<vmem>>, vector<8x1xi32>
    %c4_i32 = arith.constant 4 : i32
    %4 = arith.muli %arg1, %c4_i32 : i32
    %c0_2 = arith.constant 0 : index
    %c0_3 = arith.constant 0 : index
    %c0_4 = arith.constant 0 : index
    %5 = vector.load %arg4[%c0_2, %c0_3, %c0_4] : memref<4x32x32xbf16, #tpu.memory_space<vmem>>, vector<1x32x32xbf16>
    %6 = vector.shape_cast %5 : vector<1x32x32xbf16> to vector<32x32xbf16>
    %c1 = arith.constant 1 : index
    %c0_5 = arith.constant 0 : index
    %c0_6 = arith.constant 0 : index
    %7 = vector.load %arg4[%c1, %c0_5, %c0_6] : memref<4x32x32xbf16, #tpu.memory_space<vmem>>, vector<1x32x32xbf16>
    %8 = vector.shape_cast %7 : vector<1x32x32xbf16> to vector<32x32xbf16>
    %c2 = arith.constant 2 : index
    %c0_7 = arith.constant 0 : index
    %c0_8 = arith.constant 0 : index
    %9 = vector.load %arg4[%c2, %c0_7, %c0_8] : memref<4x32x32xbf16, #tpu.memory_space<vmem>>, vector<1x32x32xbf16>
    %10 = vector.shape_cast %9 : vector<1x32x32xbf16> to vector<32x32xbf16>
    %c3 = arith.constant 3 : index
    %c0_9 = arith.constant 0 : index
    %c0_10 = arith.constant 0 : index
    %11 = vector.load %arg4[%c3, %c0_9, %c0_10] : memref<4x32x32xbf16, #tpu.memory_space<vmem>>, vector<1x32x32xbf16>
    %12 = vector.shape_cast %11 : vector<1x32x32xbf16> to vector<32x32xbf16>
    %c0_11 = arith.constant 0 : index
    %c0_12 = arith.constant 0 : index
    %13 = vector.load %arg11[%c0_11, %c0_12] : memref<8x32xf32, #tpu.memory_space<vmem>>, vector<8x32xf32>
    %c0_13 = arith.constant 0 : index
    %c0_14 = arith.constant 0 : index
    %14 = vector.load %arg12[%c0_13, %c0_14] : memref<8x32xf32, #tpu.memory_space<vmem>>, vector<8x32xf32>
    %c0_i32_15 = arith.constant 0 : i32
    %15 = arith.truncf %13 : vector<8x32xf32> to vector<8x32xbf16>
    %16 = arith.index_cast %c0_i32_15 : i32 to index
    %c0_16 = arith.constant 0 : index
    %c0_17 = arith.constant 0 : index
    %c0_18 = arith.constant 0 : index
    %17 = vector.load %arg3[%16, %c0_16, %c0_17, %c0_18] : memref<4x4x8x32xf32, #tpu.memory_space<vmem>>, vector<1x4x8x32xf32>
    %18 = vector.shape_cast %17 : vector<1x4x8x32xf32> to vector<4x8x32xf32>
    %19 = vector.extract_strided_slice %18 {offsets = [0, 0, 0], sizes = [1, 8, 32], strides = [1, 1, 1]} : vector<4x8x32xf32> to vector<1x8x32xf32>
    %20 = vector.shape_cast %19 : vector<1x8x32xf32> to vector<8x32xf32>
    %cst = arith.constant dense<0.000000e+00> : vector<8x32xf32>
    %21 = tpu.matmul %15, %6, %cst {dimension_numbers = #tpu.dot_dimension_numbers<[1], [0], [0], [1], [0, 0, 1, 1], [], []>} : vector<8x32xbf16>, vector<32x32xbf16>, vector<8x32xf32> -> vector<8x32xf32>
    %22 = arith.addf %20, %21 : vector<8x32xf32>
    %23 = arith.negf %22 : vector<8x32xf32>
    %24 = math.exp %23 : vector<8x32xf32>
    %cst_19 = arith.constant 1.000000e+00 : f32
    %25 = vector.broadcast %cst_19 : f32 to vector<8x32xf32>
    %26 = arith.addf %25, %24 : vector<8x32xf32>
    %27 = arith.divf %25, %26 : vector<8x32xf32>
    %28 = vector.extract_strided_slice %18 {offsets = [1, 0, 0], sizes = [1, 8, 32], strides = [1, 1, 1]} : vector<4x8x32xf32> to vector<1x8x32xf32>
    %29 = vector.shape_cast %28 : vector<1x8x32xf32> to vector<8x32xf32>
    %cst_20 = arith.constant dense<0.000000e+00> : vector<8x32xf32>
    %30 = tpu.matmul %15, %8, %cst_20 {dimension_numbers = #tpu.dot_dimension_numbers<[1], [0], [0], [1], [0, 0, 1, 1], [], []>} : vector<8x32xbf16>, vector<32x32xbf16>, vector<8x32xf32> -> vector<8x32xf32>
    %31 = arith.addf %29, %30 : vector<8x32xf32>
    %32 = arith.negf %31 : vector<8x32xf32>
    %33 = math.exp %32 : vector<8x32xf32>
    %cst_21 = arith.constant 1.000000e+00 : f32
    %34 = vector.broadcast %cst_21 : f32 to vector<8x32xf32>
    %35 = arith.addf %34, %33 : vector<8x32xf32>
    %36 = arith.divf %34, %35 : vector<8x32xf32>
    %37 = vector.extract_strided_slice %18 {offsets = [2, 0, 0], sizes = [1, 8, 32], strides = [1, 1, 1]} : vector<4x8x32xf32> to vector<1x8x32xf32>
    %38 = vector.shape_cast %37 : vector<1x8x32xf32> to vector<8x32xf32>
    %cst_22 = arith.constant dense<0.000000e+00> : vector<8x32xf32>
    %39 = tpu.matmul %15, %10, %cst_22 {dimension_numbers = #tpu.dot_dimension_numbers<[1], [0], [0], [1], [0, 0, 1, 1], [], []>} : vector<8x32xbf16>, vector<32x32xbf16>, vector<8x32xf32> -> vector<8x32xf32>
    %40 = arith.addf %38, %39 : vector<8x32xf32>
    %41 = math.tanh %40 : vector<8x32xf32>
    %42 = vector.extract_strided_slice %18 {offsets = [3, 0, 0], sizes = [1, 8, 32], strides = [1, 1, 1]} : vector<4x8x32xf32> to vector<1x8x32xf32>
    %43 = vector.shape_cast %42 : vector<1x8x32xf32> to vector<8x32xf32>
    %cst_23 = arith.constant dense<0.000000e+00> : vector<8x32xf32>
    %44 = tpu.matmul %15, %12, %cst_23 {dimension_numbers = #tpu.dot_dimension_numbers<[1], [0], [0], [1], [0, 0, 1, 1], [], []>} : vector<8x32xbf16>, vector<32x32xbf16>, vector<8x32xf32> -> vector<8x32xf32>
    %45 = arith.addf %43, %44 : vector<8x32xf32>
    %46 = arith.negf %45 : vector<8x32xf32>
    %47 = math.exp %46 : vector<8x32xf32>
    %cst_24 = arith.constant 1.000000e+00 : f32
    %48 = vector.broadcast %cst_24 : f32 to vector<8x32xf32>
    %49 = arith.addf %48, %47 : vector<8x32xf32>
    %50 = arith.divf %48, %49 : vector<8x32xf32>
    %51 = arith.mulf %36, %14 : vector<8x32xf32>
    %52 = arith.mulf %27, %41 : vector<8x32xf32>
    %53 = arith.addf %51, %52 : vector<8x32xf32>
    %54 = math.tanh %53 : vector<8x32xf32>
    %55 = arith.mulf %50, %54 : vector<8x32xf32>
    %56 = arith.addi %4, %c0_i32_15 : i32
    %57 = vector.broadcast %56 : i32 to vector<8x1xi32>
    %58 = arith.cmpi slt, %57, %3 : vector<8x1xi32>
    %59 = vector.shape_cast %58 : vector<8x1xi1> to vector<8x1xi1>
    %60 = vector.broadcast %59 : vector<8x1xi1> to vector<8x32xi1>
    %61 = arith.select %60, %55, %13 : vector<8x32xi1>, vector<8x32xf32>
    %62 = vector.shape_cast %58 : vector<8x1xi1> to vector<8x1xi1>
    %63 = vector.broadcast %62 : vector<8x1xi1> to vector<8x32xi1>
    %64 = arith.select %63, %53, %14 : vector<8x32xi1>, vector<8x32xf32>
    %c1_i32 = arith.constant 1 : i32
    %65 = arith.truncf %61 : vector<8x32xf32> to vector<8x32xbf16>
    %66 = arith.index_cast %c1_i32 : i32 to index
    %c0_25 = arith.constant 0 : index
    %c0_26 = arith.constant 0 : index
    %c0_27 = arith.constant 0 : index
    %67 = vector.load %arg3[%66, %c0_25, %c0_26, %c0_27] : memref<4x4x8x32xf32, #tpu.memory_space<vmem>>, vector<1x4x8x32xf32>
    %68 = vector.shape_cast %67 : vector<1x4x8x32xf32> to vector<4x8x32xf32>
    %69 = vector.extract_strided_slice %68 {offsets = [0, 0, 0], sizes = [1, 8, 32], strides = [1, 1, 1]} : vector<4x8x32xf32> to vector<1x8x32xf32>
    %70 = vector.shape_cast %69 : vector<1x8x32xf32> to vector<8x32xf32>
    %cst_28 = arith.constant dense<0.000000e+00> : vector<8x32xf32>
    %71 = tpu.matmul %65, %6, %cst_28 {dimension_numbers = #tpu.dot_dimension_numbers<[1], [0], [0], [1], [0, 0, 1, 1], [], []>} : vector<8x32xbf16>, vector<32x32xbf16>, vector<8x32xf32> -> vector<8x32xf32>
    %72 = arith.addf %70, %71 : vector<8x32xf32>
    %73 = arith.negf %72 : vector<8x32xf32>
    %74 = math.exp %73 : vector<8x32xf32>
    %cst_29 = arith.constant 1.000000e+00 : f32
    %75 = vector.broadcast %cst_29 : f32 to vector<8x32xf32>
    %76 = arith.addf %75, %74 : vector<8x32xf32>
    %77 = arith.divf %75, %76 : vector<8x32xf32>
    %78 = vector.extract_strided_slice %68 {offsets = [1, 0, 0], sizes = [1, 8, 32], strides = [1, 1, 1]} : vector<4x8x32xf32> to vector<1x8x32xf32>
    %79 = vector.shape_cast %78 : vector<1x8x32xf32> to vector<8x32xf32>
    %cst_30 = arith.constant dense<0.000000e+00> : vector<8x32xf32>
    %80 = tpu.matmul %65, %8, %cst_30 {dimension_numbers = #tpu.dot_dimension_numbers<[1], [0], [0], [1], [0, 0, 1, 1], [], []>} : vector<8x32xbf16>, vector<32x32xbf16>, vector<8x32xf32> -> vector<8x32xf32>
    %81 = arith.addf %79, %80 : vector<8x32xf32>
    %82 = arith.negf %81 : vector<8x32xf32>
    %83 = math.exp %82 : vector<8x32xf32>
    %cst_31 = arith.constant 1.000000e+00 : f32
    %84 = vector.broadcast %cst_31 : f32 to vector<8x32xf32>
    %85 = arith.addf %84, %83 : vector<8x32xf32>
    %86 = arith.divf %84, %85 : vector<8x32xf32>
    %87 = vector.extract_strided_slice %68 {offsets = [2, 0, 0], sizes = [1, 8, 32], strides = [1, 1, 1]} : vector<4x8x32xf32> to vector<1x8x32xf32>
    %88 = vector.shape_cast %87 : vector<1x8x32xf32> to vector<8x32xf32>
    %cst_32 = arith.constant dense<0.000000e+00> : vector<8x32xf32>
    %89 = tpu.matmul %65, %10, %cst_32 {dimension_numbers = #tpu.dot_dimension_numbers<[1], [0], [0], [1], [0, 0, 1, 1], [], []>} : vector<8x32xbf16>, vector<32x32xbf16>, vector<8x32xf32> -> vector<8x32xf32>
    %90 = arith.addf %88, %89 : vector<8x32xf32>
    %91 = math.tanh %90 : vector<8x32xf32>
    %92 = vector.extract_strided_slice %68 {offsets = [3, 0, 0], sizes = [1, 8, 32], strides = [1, 1, 1]} : vector<4x8x32xf32> to vector<1x8x32xf32>
    %93 = vector.shape_cast %92 : vector<1x8x32xf32> to vector<8x32xf32>
    %cst_33 = arith.constant dense<0.000000e+00> : vector<8x32xf32>
    %94 = tpu.matmul %65, %12, %cst_33 {dimension_numbers = #tpu.dot_dimension_numbers<[1], [0], [0], [1], [0, 0, 1, 1], [], []>} : vector<8x32xbf16>, vector<32x32xbf16>, vector<8x32xf32> -> vector<8x32xf32>
    %95 = arith.addf %93, %94 : vector<8x32xf32>
    %96 = arith.negf %95 : vector<8x32xf32>
    %97 = math.exp %96 : vector<8x32xf32>
    %cst_34 = arith.constant 1.000000e+00 : f32
    %98 = vector.broadcast %cst_34 : f32 to vector<8x32xf32>
    %99 = arith.addf %98, %97 : vector<8x32xf32>
    %100 = arith.divf %98, %99 : vector<8x32xf32>
    %101 = arith.mulf %86, %64 : vector<8x32xf32>
    %102 = arith.mulf %77, %91 : vector<8x32xf32>
    %103 = arith.addf %101, %102 : vector<8x32xf32>
    %104 = math.tanh %103 : vector<8x32xf32>
    %105 = arith.mulf %100, %104 : vector<8x32xf32>
    %106 = arith.addi %4, %c1_i32 : i32
    %107 = vector.broadcast %106 : i32 to vector<8x1xi32>
    %108 = arith.cmpi slt, %107, %3 : vector<8x1xi32>
    %109 = vector.shape_cast %108 : vector<8x1xi1> to vector<8x1xi1>
    %110 = vector.broadcast %109 : vector<8x1xi1> to vector<8x32xi1>
    %111 = arith.select %110, %105, %61 : vector<8x32xi1>, vector<8x32xf32>
    %112 = vector.shape_cast %108 : vector<8x1xi1> to vector<8x1xi1>
    %113 = vector.broadcast %112 : vector<8x1xi1> to vector<8x32xi1>
    %114 = arith.select %113, %103, %64 : vector<8x32xi1>, vector<8x32xf32>
    %c2_i32 = arith.constant 2 : i32
    %115 = arith.truncf %111 : vector<8x32xf32> to vector<8x32xbf16>
    %116 = arith.index_cast %c2_i32 : i32 to index
    %c0_35 = arith.constant 0 : index
    %c0_36 = arith.constant 0 : index
    %c0_37 = arith.constant 0 : index
    %117 = vector.load %arg3[%116, %c0_35, %c0_36, %c0_37] : memref<4x4x8x32xf32, #tpu.memory_space<vmem>>, vector<1x4x8x32xf32>
    %118 = vector.shape_cast %117 : vector<1x4x8x32xf32> to vector<4x8x32xf32>
    %119 = vector.extract_strided_slice %118 {offsets = [0, 0, 0], sizes = [1, 8, 32], strides = [1, 1, 1]} : vector<4x8x32xf32> to vector<1x8x32xf32>
    %120 = vector.shape_cast %119 : vector<1x8x32xf32> to vector<8x32xf32>
    %cst_38 = arith.constant dense<0.000000e+00> : vector<8x32xf32>
    %121 = tpu.matmul %115, %6, %cst_38 {dimension_numbers = #tpu.dot_dimension_numbers<[1], [0], [0], [1], [0, 0, 1, 1], [], []>} : vector<8x32xbf16>, vector<32x32xbf16>, vector<8x32xf32> -> vector<8x32xf32>
    %122 = arith.addf %120, %121 : vector<8x32xf32>
    %123 = arith.negf %122 : vector<8x32xf32>
    %124 = math.exp %123 : vector<8x32xf32>
    %cst_39 = arith.constant 1.000000e+00 : f32
    %125 = vector.broadcast %cst_39 : f32 to vector<8x32xf32>
    %126 = arith.addf %125, %124 : vector<8x32xf32>
    %127 = arith.divf %125, %126 : vector<8x32xf32>
    %128 = vector.extract_strided_slice %118 {offsets = [1, 0, 0], sizes = [1, 8, 32], strides = [1, 1, 1]} : vector<4x8x32xf32> to vector<1x8x32xf32>
    %129 = vector.shape_cast %128 : vector<1x8x32xf32> to vector<8x32xf32>
    %cst_40 = arith.constant dense<0.000000e+00> : vector<8x32xf32>
    %130 = tpu.matmul %115, %8, %cst_40 {dimension_numbers = #tpu.dot_dimension_numbers<[1], [0], [0], [1], [0, 0, 1, 1], [], []>} : vector<8x32xbf16>, vector<32x32xbf16>, vector<8x32xf32> -> vector<8x32xf32>
    %131 = arith.addf %129, %130 : vector<8x32xf32>
    %132 = arith.negf %131 : vector<8x32xf32>
    %133 = math.exp %132 : vector<8x32xf32>
    %cst_41 = arith.constant 1.000000e+00 : f32
    %134 = vector.broadcast %cst_41 : f32 to vector<8x32xf32>
    %135 = arith.addf %134, %133 : vector<8x32xf32>
    %136 = arith.divf %134, %135 : vector<8x32xf32>
    %137 = vector.extract_strided_slice %118 {offsets = [2, 0, 0], sizes = [1, 8, 32], strides = [1, 1, 1]} : vector<4x8x32xf32> to vector<1x8x32xf32>
    %138 = vector.shape_cast %137 : vector<1x8x32xf32> to vector<8x32xf32>
    %cst_42 = arith.constant dense<0.000000e+00> : vector<8x32xf32>
    %139 = tpu.matmul %115, %10, %cst_42 {dimension_numbers = #tpu.dot_dimension_numbers<[1], [0], [0], [1], [0, 0, 1, 1], [], []>} : vector<8x32xbf16>, vector<32x32xbf16>, vector<8x32xf32> -> vector<8x32xf32>
    %140 = arith.addf %138, %139 : vector<8x32xf32>
    %141 = math.tanh %140 : vector<8x32xf32>
    %142 = vector.extract_strided_slice %118 {offsets = [3, 0, 0], sizes = [1, 8, 32], strides = [1, 1, 1]} : vector<4x8x32xf32> to vector<1x8x32xf32>
    %143 = vector.shape_cast %142 : vector<1x8x32xf32> to vector<8x32xf32>
    %cst_43 = arith.constant dense<0.000000e+00> : vector<8x32xf32>
    %144 = tpu.matmul %115, %12, %cst_43 {dimension_numbers = #tpu.dot_dimension_numbers<[1], [0], [0], [1], [0, 0, 1, 1], [], []>} : vector<8x32xbf16>, vector<32x32xbf16>, vector<8x32xf32> -> vector<8x32xf32>
    %145 = arith.addf %143, %144 : vector<8x32xf32>
    %146 = arith.negf %145 : vector<8x32xf32>
    %147 = math.exp %146 : vector<8x32xf32>
    %cst_44 = arith.constant 1.000000e+00 : f32
    %148 = vector.broadcast %cst_44 : f32 to vector<8x32xf32>
    %149 = arith.addf %148, %147 : vector<8x32xf32>
    %150 = arith.divf %148, %149 : vector<8x32xf32>
    %151 = arith.mulf %136, %114 : vector<8x32xf32>
    %152 = arith.mulf %127, %141 : vector<8x32xf32>
    %153 = arith.addf %151, %152 : vector<8x32xf32>
    %154 = math.tanh %153 : vector<8x32xf32>
    %155 = arith.mulf %150, %154 : vector<8x32xf32>
    %156 = arith.addi %4, %c2_i32 : i32
    %157 = vector.broadcast %156 : i32 to vector<8x1xi32>
    %158 = arith.cmpi slt, %157, %3 : vector<8x1xi32>
    %159 = vector.shape_cast %158 : vector<8x1xi1> to vector<8x1xi1>
    %160 = vector.broadcast %159 : vector<8x1xi1> to vector<8x32xi1>
    %161 = arith.select %160, %155, %111 : vector<8x32xi1>, vector<8x32xf32>
    %162 = vector.shape_cast %158 : vector<8x1xi1> to vector<8x1xi1>
    %163 = vector.broadcast %162 : vector<8x1xi1> to vector<8x32xi1>
    %164 = arith.select %163, %153, %114 : vector<8x32xi1>, vector<8x32xf32>
    %c3_i32 = arith.constant 3 : i32
    %165 = arith.truncf %161 : vector<8x32xf32> to vector<8x32xbf16>
    %166 = arith.index_cast %c3_i32 : i32 to index
    %c0_45 = arith.constant 0 : index
    %c0_46 = arith.constant 0 : index
    %c0_47 = arith.constant 0 : index
    %167 = vector.load %arg3[%166, %c0_45, %c0_46, %c0_47] : memref<4x4x8x32xf32, #tpu.memory_space<vmem>>, vector<1x4x8x32xf32>
    %168 = vector.shape_cast %167 : vector<1x4x8x32xf32> to vector<4x8x32xf32>
    %169 = vector.extract_strided_slice %168 {offsets = [0, 0, 0], sizes = [1, 8, 32], strides = [1, 1, 1]} : vector<4x8x32xf32> to vector<1x8x32xf32>
    %170 = vector.shape_cast %169 : vector<1x8x32xf32> to vector<8x32xf32>
    %cst_48 = arith.constant dense<0.000000e+00> : vector<8x32xf32>
    %171 = tpu.matmul %165, %6, %cst_48 {dimension_numbers = #tpu.dot_dimension_numbers<[1], [0], [0], [1], [0, 0, 1, 1], [], []>} : vector<8x32xbf16>, vector<32x32xbf16>, vector<8x32xf32> -> vector<8x32xf32>
    %172 = arith.addf %170, %171 : vector<8x32xf32>
    %173 = arith.negf %172 : vector<8x32xf32>
    %174 = math.exp %173 : vector<8x32xf32>
    %cst_49 = arith.constant 1.000000e+00 : f32
    %175 = vector.broadcast %cst_49 : f32 to vector<8x32xf32>
    %176 = arith.addf %175, %174 : vector<8x32xf32>
    %177 = arith.divf %175, %176 : vector<8x32xf32>
    %178 = vector.extract_strided_slice %168 {offsets = [1, 0, 0], sizes = [1, 8, 32], strides = [1, 1, 1]} : vector<4x8x32xf32> to vector<1x8x32xf32>
    %179 = vector.shape_cast %178 : vector<1x8x32xf32> to vector<8x32xf32>
    %cst_50 = arith.constant dense<0.000000e+00> : vector<8x32xf32>
    %180 = tpu.matmul %165, %8, %cst_50 {dimension_numbers = #tpu.dot_dimension_numbers<[1], [0], [0], [1], [0, 0, 1, 1], [], []>} : vector<8x32xbf16>, vector<32x32xbf16>, vector<8x32xf32> -> vector<8x32xf32>
    %181 = arith.addf %179, %180 : vector<8x32xf32>
    %182 = arith.negf %181 : vector<8x32xf32>
    %183 = math.exp %182 : vector<8x32xf32>
    %cst_51 = arith.constant 1.000000e+00 : f32
    %184 = vector.broadcast %cst_51 : f32 to vector<8x32xf32>
    %185 = arith.addf %184, %183 : vector<8x32xf32>
    %186 = arith.divf %184, %185 : vector<8x32xf32>
    %187 = vector.extract_strided_slice %168 {offsets = [2, 0, 0], sizes = [1, 8, 32], strides = [1, 1, 1]} : vector<4x8x32xf32> to vector<1x8x32xf32>
    %188 = vector.shape_cast %187 : vector<1x8x32xf32> to vector<8x32xf32>
    %cst_52 = arith.constant dense<0.000000e+00> : vector<8x32xf32>
    %189 = tpu.matmul %165, %10, %cst_52 {dimension_numbers = #tpu.dot_dimension_numbers<[1], [0], [0], [1], [0, 0, 1, 1], [], []>} : vector<8x32xbf16>, vector<32x32xbf16>, vector<8x32xf32> -> vector<8x32xf32>
    %190 = arith.addf %188, %189 : vector<8x32xf32>
    %191 = math.tanh %190 : vector<8x32xf32>
    %192 = vector.extract_strided_slice %168 {offsets = [3, 0, 0], sizes = [1, 8, 32], strides = [1, 1, 1]} : vector<4x8x32xf32> to vector<1x8x32xf32>
    %193 = vector.shape_cast %192 : vector<1x8x32xf32> to vector<8x32xf32>
    %cst_53 = arith.constant dense<0.000000e+00> : vector<8x32xf32>
    %194 = tpu.matmul %165, %12, %cst_53 {dimension_numbers = #tpu.dot_dimension_numbers<[1], [0], [0], [1], [0, 0, 1, 1], [], []>} : vector<8x32xbf16>, vector<32x32xbf16>, vector<8x32xf32> -> vector<8x32xf32>
    %195 = arith.addf %193, %194 : vector<8x32xf32>
    %196 = arith.negf %195 : vector<8x32xf32>
    %197 = math.exp %196 : vector<8x32xf32>
    %cst_54 = arith.constant 1.000000e+00 : f32
    %198 = vector.broadcast %cst_54 : f32 to vector<8x32xf32>
    %199 = arith.addf %198, %197 : vector<8x32xf32>
    %200 = arith.divf %198, %199 : vector<8x32xf32>
    %201 = arith.mulf %186, %164 : vector<8x32xf32>
    %202 = arith.mulf %177, %191 : vector<8x32xf32>
    %203 = arith.addf %201, %202 : vector<8x32xf32>
    %204 = math.tanh %203 : vector<8x32xf32>
    %205 = arith.mulf %200, %204 : vector<8x32xf32>
    %206 = arith.addi %4, %c3_i32 : i32
    %207 = vector.broadcast %206 : i32 to vector<8x1xi32>
    %208 = arith.cmpi slt, %207, %3 : vector<8x1xi32>
    %209 = vector.shape_cast %208 : vector<8x1xi1> to vector<8x1xi1>
    %210 = vector.broadcast %209 : vector<8x1xi1> to vector<8x32xi1>
    %211 = arith.select %210, %205, %161 : vector<8x32xi1>, vector<8x32xf32>
    %212 = vector.shape_cast %208 : vector<8x1xi1> to vector<8x1xi1>
    %213 = vector.broadcast %212 : vector<8x1xi1> to vector<8x32xi1>
    %214 = arith.select %213, %203, %164 : vector<8x32xi1>, vector<8x32xf32>
    %c4_i32_55 = arith.constant 4 : i32
    %c0_56 = arith.constant 0 : index
    %c0_57 = arith.constant 0 : index
    %215 = vector.load %arg11[%c0_56, %c0_57] : memref<8x32xf32, #tpu.memory_space<vmem>>, vector<8x32xf32>
    tpu.vector_store %arg11[%c0_56, %c0_57], %211 {strides = array<i32>} : memref<8x32xf32, #tpu.memory_space<vmem>>, vector<8x32xf32>,
    %c0_58 = arith.constant 0 : index
    %c0_59 = arith.constant 0 : index
    %216 = vector.load %arg12[%c0_58, %c0_59] : memref<8x32xf32, #tpu.memory_space<vmem>>, vector<8x32xf32>
    tpu.vector_store %arg12[%c0_58, %c0_59], %214 {strides = array<i32>} : memref<8x32xf32, #tpu.memory_space<vmem>>, vector<8x32xf32>,
    %c1_i32_60 = arith.constant 1 : i32
    %217 = arith.cmpi eq, %arg1, %c1_i32_60 : i32
    %218 = arith.extui %217 : i1 to i32
    %c0_i32_61 = arith.constant 0 : i32
    %219 = arith.cmpi ne, %218, %c0_i32_61 : i32
    scf.if %219 {
      %220 = arith.truncf %211 : vector<8x32xf32> to vector<8x32xbf16>
      %c0_62 = arith.constant 0 : index
      %c0_63 = arith.constant 0 : index
      %221 = vector.load %arg5[%c0_62, %c0_63] : memref<32x3xbf16, #tpu.memory_space<vmem>>, vector<32x3xbf16>
      %cst_64 = arith.constant dense<0.000000e+00> : vector<8x3xf32>
      %222 = tpu.matmul %220, %221, %cst_64 {dimension_numbers = #tpu.dot_dimension_numbers<[1], [0], [0], [1], [0, 0, 1, 1], [], []>} : vector<8x32xbf16>, vector<32x3xbf16>, vector<8x3xf32> -> vector<8x3xf32>
      %c0_65 = arith.constant 0 : index
      %c0_66 = arith.constant 0 : index
      %223 = vector.load %arg6[%c0_65, %c0_66] : memref<1x3xf32, #tpu.memory_space<vmem>>, vector<1x3xf32>
      %224 = vector.broadcast %223 : vector<1x3xf32> to vector<8x3xf32>
      %225 = arith.addf %222, %224 : vector<8x3xf32>
      %c0_67 = arith.constant 0 : index
      %c0_68 = arith.constant 0 : index
      %226 = vector.load %arg9[%c0_67, %c0_68] : memref<8x3xf32, #tpu.memory_space<vmem>>, vector<8x3xf32>
      tpu.vector_store %arg9[%c0_67, %c0_68], %225 {strides = array<i32>} : memref<8x3xf32, #tpu.memory_space<vmem>>, vector<8x3xf32>,
      %c0_69 = arith.constant 0 : index
      %c0_70 = arith.constant 0 : index
      %227 = vector.load %arg7[%c0_69, %c0_70] : memref<32x3xbf16, #tpu.memory_space<vmem>>, vector<32x3xbf16>
      %cst_71 = arith.constant dense<0.000000e+00> : vector<8x3xf32>
      %228 = tpu.matmul %220, %227, %cst_71 {dimension_numbers = #tpu.dot_dimension_numbers<[1], [0], [0], [1], [0, 0, 1, 1], [], []>} : vector<8x32xbf16>, vector<32x3xbf16>, vector<8x3xf32> -> vector<8x3xf32>
      %c0_72 = arith.constant 0 : index
      %c0_73 = arith.constant 0 : index
      %229 = vector.load %arg8[%c0_72, %c0_73] : memref<1x3xf32, #tpu.memory_space<vmem>>, vector<1x3xf32>
      %230 = vector.broadcast %229 : vector<1x3xf32> to vector<8x3xf32>
      %231 = arith.addf %228, %230 : vector<8x3xf32>
      %c0_74 = arith.constant 0 : index
      %c0_75 = arith.constant 0 : index
      %232 = vector.load %arg10[%c0_74, %c0_75] : memref<8x3xf32, #tpu.memory_space<vmem>>, vector<8x3xf32>
      tpu.vector_store %arg10[%c0_74, %c0_75], %231 {strides = array<i32>} : memref<8x3xf32, #tpu.memory_space<vmem>>, vector<8x3xf32>,
    } else {
    }
    return
  }
  func.func @transform_0(%arg0: i32, %arg1: i32) -> (i32, i32) {
    %c0_i32 = arith.constant 0 : i32
    %c0_i32_0 = arith.constant 0 : i32
    return %arg0, %c0_i32 : i32, i32
  }
  func.func @transform_1(%arg0: i32, %arg1: i32) -> (i32, i32, i32, i32) {
    %c0_i32 = arith.constant 0 : i32
    %c0_i32_0 = arith.constant 0 : i32
    %c0_i32_1 = arith.constant 0 : i32
    return %arg1, %c0_i32, %arg0, %c0_i32_0 : i32, i32, i32, i32
  }
  func.func @transform_2(%arg0: i32, %arg1: i32) -> (i32, i32, i32) {
    %c0_i32 = arith.constant 0 : i32
    %c0_i32_0 = arith.constant 0 : i32
    %c0_i32_1 = arith.constant 0 : i32
    %c0_i32_2 = arith.constant 0 : i32
    return %c0_i32, %c0_i32_0, %c0_i32_1 : i32, i32, i32
  }
  func.func @transform_3(%arg0: i32, %arg1: i32) -> (i32, i32) {
    %c0_i32 = arith.constant 0 : i32
    %c0_i32_0 = arith.constant 0 : i32
    %c0_i32_1 = arith.constant 0 : i32
    return %c0_i32, %c0_i32_0 : i32, i32
  }
  func.func @transform_4(%arg0: i32, %arg1: i32) -> (i32, i32) {
    %c0_i32 = arith.constant 0 : i32
    %c0_i32_0 = arith.constant 0 : i32
    %c0_i32_1 = arith.constant 0 : i32
    return %c0_i32, %c0_i32_0 : i32, i32
  }
  func.func @transform_5(%arg0: i32, %arg1: i32) -> (i32, i32) {
    %c0_i32 = arith.constant 0 : i32
    %c0_i32_0 = arith.constant 0 : i32
    %c0_i32_1 = arith.constant 0 : i32
    return %c0_i32, %c0_i32_0 : i32, i32
  }
  func.func @transform_6(%arg0: i32, %arg1: i32) -> (i32, i32) {
    %c0_i32 = arith.constant 0 : i32
    %c0_i32_0 = arith.constant 0 : i32
    %c0_i32_1 = arith.constant 0 : i32
    return %c0_i32, %c0_i32_0 : i32, i32
  }
  func.func @transform_7(%arg0: i32, %arg1: i32) -> (i32, i32) {
    %c0_i32 = arith.constant 0 : i32
    %c0_i32_0 = arith.constant 0 : i32
    return %arg0, %c0_i32 : i32, i32
  }
  func.func @transform_8(%arg0: i32, %arg1: i32) -> (i32, i32) {
    %c0_i32 = arith.constant 0 : i32
    %c0_i32_0 = arith.constant 0 : i32
    return %arg0, %c0_i32 : i32, i32
  }
}

</mosaic_0001>

<bundles_post_ra>
// kernel: tad_lstm_forward.1
= control target key start
LH: loop header
LB: loop body
LE: loop exit
PB: predicated region body
PF: predicated region fallthrough
CT: control target
= control target key end

     0   :  { %s1978_s27 = smov 0   ;;  %s1980_s28 = smov 0   ;;  %s2266_s0 = inlined_call_operand.vmem [shape: s32[8,1], index: 0, kind: input, shape index: {}]   ;;  %s2267_s1 = inlined_call_operand.vmem [shape: f32[8,4,8,32], index: 1, kind: input, shape index: {}]   ;;  %s2268_s2 = inlined_call_operand.vmem [shape: bf16[4,32,32], index: 2, kind: input, shape index: {}]   ;;  %s2269_s3 = inlined_call_operand.vmem [shape: bf16[32,3], index: 3, kind: input, shape index: {}]   ;;  %s2270_s4 = inlined_call_operand.vmem [shape: f32[1,3], index: 4, kind: input, shape index: {}]   ;;  %s2271_s5 = inlined_call_operand.vmem [shape: bf16[32,3], index: 5, kind: input, shape index: {}]   ;;  %s2272_s6 = inlined_call_operand.vmem [shape: f32[1,3], index: 6, kind: input, shape index: {}]   ;;  %s2273_s7 = inlined_call_operand.vmem [shape: f32[8,3], index: 7, kind: output, shape index: {0}]   ;;  %s2274_s8 = inlined_call_operand.vmem [shape: f32[8,3], index: 8, kind: output, shape index: {1}]  }
   0x1   :  { %s1982_s29 = smov 0  }
   0x2 LB: > { %s28_s30 = sadd.s32 1, %s1921_s28  ;;  %p1517_p0 = scmp.ge.s32.totalorder %s1925_s29, 1  ;;  %s1925_s29 = sphi %s1982_s29, %s19_s29   ;;  %s1921_s28 = sphi %s1980_s28, %s2276_s28   ;;  %s1917_s27 = sphi %s1978_s27, %s2275_s27  }
   0x3   : > { %p29_p1 = scmp.ge.s32.totalorder %s28_s30, 2  ;;  %p293_p2 = scmp.lt.s32.totalorder %s1925_s29, 3 }
   0x5   : > { %s2278_s30 = smov (%p29_p1, %s28_s30), 0  ;;  %p294_p3 = pnand %p1517_p0, %p293_p2 }
   0x6   : > { %s1999_s9 = sshll.u32 (!%p294_p3), %s1917_s27, 2  ;;  %p1521_p5 = scmp.ne.s32.totalorder (!%p294_p3), %s1917_s27, 0 }
   0x7   : > { %297 = sbr.rel (%p294_p3) target bundleno = 1241 (0x4d9), region = 48  ;;  %p343_p4 = scmp.lt.s32.totalorder (!%p294_p3), %s1999_s9, 7 }
   0xc   : > { %s344_s10 = scalar_select %p343_p4, %s1999_s9, 7 }
   0xd   : > { %364 = sbr.rel (%p1521_p5) target bundleno = 20 (0x14), region = 52 }
   0xe   : > { %s1596_s11 = sshll.u32 %s344_s10, 5 }
   0xf   : > { %s2006_s14 = scalar_lea.vmem %s2267_s1, %s1596_s11 }
  0x12   : > { %vm365_vm0 = vcmask 261120   ;;  %v1927_v0 = vmov 0.0  }
  0x13   : > { %366 = vst.msk [vmem:[#allocation2] sm:$0xff] %vm365_vm0, %v1927_v0  ;;  %367 = vst.msk [vmem:[#allocation3] sm:$0xff] %vm365_vm0, %v1927_v0 }
  0x14 PF: > { %v2012_v1 = vld [vmem:[%s2268_s2 + $0x8] sm:$0xff]   ;;  %v1928_v2 = vmov 0.0   ;;  %v2019_v3 = vld [vmem:[%s2268_s2 + $0x18] sm:$0xff]   ;;  %v2025_v4 = vld [vmem:[%s2268_s2] sm:$0xff]   ;;  %vm1929_vm1 = vmmov 0   ;;  %v1930_v8 = vmov 0   ;;  %v636_v10 = vstv %s1999_s9 }
  0x15   : > { %1651 = vmatprep.subr.bf16.mxu0 %v1928_v2  ;;  %1659 = vmatprep.subr.bf16.mxu1 %v1928_v2  ;;  %v2034_v5 = vld [vmem:[%s2268_s2 + $0x10] sm:$0xff]   ;;  %s842_s23 = sadd.s32 1, %s1999_s9  ;;  %vm408_vm2 = vcmask 261120   ;;  %v2050_v9 = vld [vmem:[%s2268_s2 + $0x28] sm:$0xff]   ;;  %v2058_v11 = vld [vmem:[%s2268_s2 + $0x38] sm:$0xff]   ;;  %s1049_s18 = sadd.s32 2, %s1999_s9 }
  0x16   : > { %1652 = vmatpush3.bf16.msra.mxu0 %v2012_v1  ;;  %1655 = vmatprep.mubr.msk.bf16.mxu0 %vm1929_vm1, %v1928_v2  ;;  %v2064_v12 = vld [vmem:[%s2266_s0] sm:$0xff]  ;;  %v843_v13 = vstv %s842_s23  ;;  %v2081_v16 = vld [vmem:[%s2268_s2 + $0x30] sm:$0xff]   ;;  %v393_v19 = vld [vmem:[%s2006_s14 + $0x8] sm:$0xff]  ;;  %s1256_s19 = sadd.s32 3, %s1999_s9  ;;  %p1583_p6 = scmp.ne.s32.totalorder %s1917_s27, 1 }
  0x17   : > { %1660 = vmatpush3.bf16.msra.mxu1 %v2019_v3  ;;  %1653 = vmatprep.subr.bf16.mxu0 %v1928_v2  ;;  %vm637_vm3 = vcmp.lt.s32.totalorder %v636_v10, %v2064_v12  ;;  %v2073_v14 = vld [vmem:[%s2268_s2 + $0x20] sm:$0xff]   ;;  %vm844_vm4 = vcmp.lt.s32.totalorder %v843_v13, %v2064_v12  ;;  %v395_v32 = vld [vmem:[%s2006_s14 + $0x18] sm:$0xff]  ;;  %v394_v38 = vld [vmem:[%s2006_s14 + $0x10] sm:$0xff] }
  0x18   : > { %1661 = vmatprep.subr.bf16.mxu1 %v1928_v2  ;;  %1663 = vmatprep.mubr.msk.bf16.mxu1 %vm1929_vm1, %v1928_v2  ;;  %v638_v15 = vsel %vm637_vm3, 1, %v1930_v8  ;;  %v845_v17 = vsel %vm844_vm4, 1, %v1930_v8  ;;  %v392_v18 = vld [vmem:[%s2006_s14] sm:$0xff] }
  0x19   : > { %1825 = vset.pattern.permute.xlu0 %v1930_v8  ;;  %1826 = vset.pattern.permute.xlu1 %v1930_v8 }
  0x1a   : > { %v2039_v6 = vld [vmem:[#allocation2] sm:$0xff]  ;;  %1654 = vmatpush3.bf16.msra.mxu0 %v2025_v4  ;;  %640 = vperm.xlu0 %1825, %v638_v15   ;;  %v390_v51 = vld [vmem:[#allocation3] sm:$0xff] }
  0x1b   : > { %v391_v7 = vpack.c.bf16 %v2039_v6, %v2039_v6  ;;  %1662 = vmatpush3.bf16.msra.mxu1 %v2034_v5  ;;  %1667 = vmatprep.subr.bf16.mxu0 %v1928_v2  ;;  %v1550_v15 = vld [vmem:[%s2006_s14 + $0x20] sm:$0xff] }
  0x1c   : > { %1675 = vmatprep.subr.bf16.mxu1 %v1928_v2 }
  0x1d   : > { %1656 = vmatmul.mubr.msk.bf16.vlgmr.msra.gmra.mxu0 %vm408_vm2, %v391_v7 }
  0x1e   : > { %1664 = vmatmul.mubr.msk.bf16.vlgmr.msra.gmra.mxu1 %vm408_vm2, %v391_v7  ;;  %1668 = vmatpush3.bf16.msra.mxu0 %v2050_v9 }
  0x1f   : > { %1676 = vmatpush3.bf16.msra.mxu1 %v2058_v11  ;;  %1669 = vmatprep.subr.bf16.mxu0 %v1928_v2 }
  0x20   : > { %1677 = vmatprep.subr.bf16.mxu1 %v1928_v2  ;;  %1671 = vmatprep.mubr.msk.bf16.mxu0 %vm1929_vm1, %v1928_v2 }
  0x21   : > { %1679 = vmatprep.mubr.msk.bf16.mxu1 %vm1929_vm1, %v1928_v2  ;;  %847 = vperm.xlu0 %1825, %v845_v17   ;;  %v1551_v17 = vld [vmem:[%s2006_s14 + $0x28] sm:$0xff] }
  0x22   : > { %1670 = vmatpush3.bf16.msra.mxu0 %v2073_v14 }
  0x23   : > { %1678 = vmatpush3.bf16.msra.mxu1 %v2081_v16  ;;  %1683 = vmatprep.subr.bf16.mxu0 %v1928_v2 }
  0x24   : > { %1691 = vmatprep.subr.bf16.mxu1 %v1928_v2 }
  0x25   : > { %1672 = vmatmul.mubr.msk.bf16.vlgmr.msra.gmra.mxu0 %vm408_vm2, %v391_v7 }
  0x26   : > { %1680 = vmatmul.mubr.msk.bf16.vlgmr.msra.gmra.mxu1 %vm408_vm2, %v391_v7  ;;  %1684 = vmatpush3.bf16.msra.mxu0 %v2012_v1  ;;  %v1257_v7 = vstv %s1256_s19 }
  0x27   : > { %1692 = vmatpush3.bf16.msra.mxu1 %v2019_v3  ;;  %1685 = vmatprep.subr.bf16.mxu0 %v1928_v2  ;;  %vm1258_vm7 = vcmp.lt.s32.totalorder %v1257_v7, %v2064_v12 }
  0x28   : > { %1693 = vmatprep.subr.bf16.mxu1 %v1928_v2  ;;  %1687 = vmatprep.mubr.msk.bf16.mxu0 %vm1929_vm1, %v1928_v2  ;;  %v1259_v13 = vsel %vm1258_vm7, 1, %v1930_v8 }
  0x29   : > { %1695 = vmatprep.mubr.msk.bf16.mxu1 %vm1929_vm1, %v1928_v2 }
  0x2a   : > { %1686 = vmatpush3.bf16.msra.mxu0 %v2025_v4 }
  0x2b   : > { %1694 = vmatpush3.bf16.msra.mxu1 %v2034_v5  ;;  %1699 = vmatprep.subr.bf16.mxu0 %v1928_v2 }
  0x2c   : > { %1707 = vmatprep.subr.bf16.mxu1 %v1928_v2 }
  0x95   : > { %v641_v54 = vpop.permute.xlu0 %640 }
  0x96   : > { %vm642_vm5 = vcmp.eq.s32.totalorder %v641_v54, 1 }
  0xdd   : > { %v446_v20 = vpop.f32.mrf.mxu0 }
  0xde   : > { %v452_v21 = vadd.f32 %v446_v20, %v392_v18  ;;  %v505_v22 = vpop.f32.mrf.mxu1 }
  0xdf   : > { %v511_v23 = vadd.f32 %v505_v22, %v393_v19  ;;  %v1657_v24 = vpop.f32.mrf.mxu0 }
  0xe0   : > { %v1538_v25 = vmul.f32 -1.442695, %v452_v21  ;;  %v1665_v26 = vpop.f32.mrf.mxu1 }
  0xe1   : > { %v1542_v27 = vmul.f32 -1.442695, %v511_v23  ;;  %v449_v28 = vpop.f32.mrf.mxu0 }
  0xe2   : > { %1835 = vpow2.f32 %v1538_v25  ;;  %v508_v29 = vpop.f32.mrf.mxu1 }
  0xe3   : > { %1837 = vpow2.f32 %v1542_v27  ;;  %v1658_v30 = vpop.f32.mrf.mxu0  ;;  %v1553_v29 = vld [vmem:[%s2006_s14 + $0x38] sm:$0xff] }
  0xe4   : > { %v1666_v31 = vpop.f32.mrf.mxu1 }
  0xe5   : > { %v564_v33 = vpop.f32.mrf.mxu0 }
  0xe6   : > { %v618_v34 = vpop.f32.mrf.mxu1  ;;  %v570_v43 = vadd.f32 %v564_v33, %v394_v38 }
  0xe7   : > { %v624_v35 = vadd.f32 %v618_v34, %v395_v32  ;;  %v1673_v36 = vpop.f32.mrf.mxu0 }
  0xe8   : > { %v1681_v37 = vpop.f32.mrf.mxu1  ;;  %v1552_v36 = vld [vmem:[%s2006_s14 + $0x30] sm:$0xff] }
  0xe9   : > { %v567_v39 = vpop.f32.mrf.mxu0  ;;  %v1549_v41 = vmul.f32 -1.442695, %v624_v35 }
  0xea   : > { %v621_v40 = vpop.f32.mrf.mxu1 }
  0xeb   : > { %v1674_v42 = vpop.f32.mrf.mxu0  ;;  %1839 = vpow2.f32 %v1549_v41 }
  0xec   : > { %v1682_v44 = vpop.f32.mrf.mxu1  ;;  %1841 = vtanh.f32 %v570_v43 }
  0xef   : > { %v1836_v45 = vpop.eup %1835 }
  0xf0   : > { %v1838_v46 = vpop.eup %1837  ;;  %v456_v47 = vadd.f32 1.0, %v1836_v45 }
  0xf1   : > { %v515_v48 = vadd.f32 1.0, %v1838_v46 }
  0xf2   : > { %1843 = vrcp.f32 %v456_v47 }
  0xf3   : > { %1845 = vrcp.f32 %v515_v48 }
  0xf8   : > { %v1840_v49 = vpop.eup %1839 }
  0xf9   : > { %v1842_v50 = vpop.eup %1841  ;;  %v628_v53 = vadd.f32 1.0, %v1840_v49 }
  0xfb   : > { %1847 = vrcp.f32 %v628_v53 }
  0xff   : > { %v1844_v52 = vpop.eup %1843 }
 0x100   : > { %v1846_v55 = vpop.eup %1845  ;;  %v632_v56 = vmul.f32 %v1844_v52, %v1842_v50 }
 0x101   : > { %v631_v57 = vmul.f32 %v1846_v55, %v390_v51 }
 0x103   : > { %v633_v58 = vadd.f32 %v632_v56, %v631_v57 }
 0x105   : > { %1849 = vtanh.f32 %v633_v58  ;;  %v2112_v59 = vsel %vm642_vm5, %v633_v58, %v390_v51  ;;  %v848_v51 = vpop.permute.xlu0 %847 }
 0x106   : > { %vm849_vm8 = vcmp.eq.s32.totalorder %v848_v51, 1 }
 0x108   : > { %v1848_v60 = vpop.eup %1847 }
 0x112   : > { %v1850_v61 = vpop.eup %1849 }
 0x113   : > { %v635_v62 = vmul.f32 %v1850_v61, %v1848_v60 }
 0x115   : > { %v2115_v63 = vsel %vm642_vm5, %v635_v62, %v2039_v6  ;;  %v1050_v6 = vstv %s1049_s18 }
 0x116   : > { %v645_v0 = vpack.c.bf16 %v2115_v63, %v2115_v63  ;;  %vm1051_vm6 = vcmp.lt.s32.totalorder %v1050_v6, %v2064_v12 }
 0x117   : > { %v1052_v10 = vsel %vm1051_vm6, 1, %v1930_v8 }
 0x118   : > { %1688 = vmatmul.mubr.msk.bf16.vlgmr.msra.gmra.mxu0 %vm408_vm2, %v645_v0  ;;  %1696 = vmatmul.mubr.msk.bf16.vlgmr.msra.gmra.mxu1 %vm408_vm2, %v645_v0 }
 0x119   : > { %1700 = vmatpush3.bf16.msra.mxu0 %v2050_v9  ;;  %1708 = vmatpush3.bf16.msra.mxu1 %v2058_v11 }
 0x11a   : > { %1701 = vmatprep.subr.bf16.mxu0 %v1928_v2  ;;  %1709 = vmatprep.subr.bf16.mxu1 %v1928_v2 }
 0x11b   : > { %1703 = vmatprep.mubr.msk.bf16.mxu0 %vm1929_vm1, %v1928_v2  ;;  %1711 = vmatprep.mubr.msk.bf16.mxu1 %vm1929_vm1, %v1928_v2 }
 0x11c   : > { %1054 = vperm.xlu1 %1826, %v1052_v10  }
 0x11d   : > { %1702 = vmatpush3.bf16.msra.mxu0 %v2073_v14  ;;  %1710 = vmatpush3.bf16.msra.mxu1 %v2081_v16 }
 0x11e   : > { %1715 = vmatprep.subr.bf16.mxu0 %v1928_v2  ;;  %1723 = vmatprep.subr.bf16.mxu1 %v1928_v2 }
 0x120   : > { %1704 = vmatmul.mubr.msk.bf16.vlgmr.msra.gmra.mxu0 %vm408_vm2, %v645_v0  ;;  %1712 = vmatmul.mubr.msk.bf16.vlgmr.msra.gmra.mxu1 %vm408_vm2, %v645_v0 }
 0x121   : > { %1716 = vmatpush3.bf16.msra.mxu0 %v2012_v1  ;;  %1724 = vmatpush3.bf16.msra.mxu1 %v2019_v3 }
 0x122   : > { %1717 = vmatprep.subr.bf16.mxu0 %v1928_v2  ;;  %1725 = vmatprep.subr.bf16.mxu1 %v1928_v2 }
 0x123   : > { %1719 = vmatprep.mubr.msk.bf16.mxu0 %vm1929_vm1, %v1928_v2  ;;  %1727 = vmatprep.mubr.msk.bf16.mxu1 %vm1929_vm1, %v1928_v2 }
 0x124   : > { %1261 = vperm.xlu1 %1826, %v1259_v13  }
 0x125   : > { %1718 = vmatpush3.bf16.msra.mxu0 %v2025_v4  ;;  %1726 = vmatpush3.bf16.msra.mxu1 %v2034_v5 }
 0x126   : > { %1731 = vmatprep.subr.bf16.mxu0 %v1928_v2  ;;  %1739 = vmatprep.subr.bf16.mxu1 %v1928_v2 }
 0x1d8   : > { %v688_v18 = vpop.f32.mrf.mxu0  ;;  %v735_v19 = vpop.f32.mrf.mxu1 }
 0x1d9   : > { %v694_v20 = vadd.f32 %v1550_v15, %v688_v18  ;;  %v741_v21 = vadd.f32 %v1551_v17, %v735_v19  ;;  %v1564_v18 = vld [vmem:[%s2006_s14 + $0x58] sm:$0xff] }
 0x1da   : > { %v1689_v22 = vpop.f32.mrf.mxu0  ;;  %v1697_v23 = vpop.f32.mrf.mxu1 }
 0x1db   : > { %v1555_v24 = vmul.f32 -1.442695, %v694_v20  ;;  %v1557_v25 = vmul.f32 -1.442695, %v741_v21 }
 0x1dc   : > { %v691_v26 = vpop.f32.mrf.mxu0  ;;  %v738_v12 = vpop.f32.mrf.mxu1 }
 0x1dd   : > { %1851 = vpow2.f32 %v1555_v24 }
 0x1de   : > { %1853 = vpow2.f32 %v1557_v25  ;;  %v1690_v27 = vpop.f32.mrf.mxu0  ;;  %v1698_v28 = vpop.f32.mrf.mxu1  ;;  %v1563_v25 = vld [vmem:[%s2006_s14 + $0x50] sm:$0xff] }
 0x1e0   : > { %v782_v8 = vpop.f32.mrf.mxu0  ;;  %v824_v30 = vpop.f32.mrf.mxu1 }
 0x1e1   : > { %v830_v33 = vadd.f32 %v1553_v29, %v824_v30  ;;  %v788_v40 = vadd.f32 %v1552_v36, %v782_v8 }
 0x1e2   : > { %v1705_v31 = vpop.f32.mrf.mxu0  ;;  %v1713_v32 = vpop.f32.mrf.mxu1 }
 0x1e3   : > { %v1560_v39 = vmul.f32 -1.442695, %v830_v33 }
 0x1e4   : > { %v785_v34 = vpop.f32.mrf.mxu0  ;;  %v827_v35 = vpop.f32.mrf.mxu1 }
 0x1e5   : > { %1855 = vpow2.f32 %v1560_v39  ;;  %v1055_v35 = vpop.permute.xlu1 %1054 }
 0x1e6   : > { %v1706_v37 = vpop.f32.mrf.mxu0  ;;  %v1714_v38 = vpop.f32.mrf.mxu1  ;;  %1857 = vtanh.f32 %v788_v40  ;;  %vm1056_vm9 = vcmp.eq.s32.totalorder %v1055_v35, 1 }
 0x1ea   : > { %v1852_v41 = vpop.eup %1851 }
 0x1eb   : > { %v1854_v42 = vpop.eup %1853  ;;  %v698_v43 = vadd.f32 1.0, %v1852_v41 }
 0x1ec   : > { %v745_v44 = vadd.f32 1.0, %v1854_v42 }
 0x1ed   : > { %1859 = vrcp.f32 %v698_v43 }
 0x1ee   : > { %1861 = vrcp.f32 %v745_v44 }
 0x1f2   : > { %v1856_v45 = vpop.eup %1855 }
 0x1f3   : > { %v1858_v46 = vpop.eup %1857  ;;  %v834_v50 = vadd.f32 1.0, %v1856_v45 }
 0x1f5   : > { %1863 = vrcp.f32 %v834_v50 }
 0x1fa   : > { %v1860_v47 = vpop.eup %1859 }
 0x1fb   : > { %v1862_v48 = vpop.eup %1861  ;;  %v838_v49 = vmul.f32 %v1860_v47, %v1858_v46 }
 0x1fc   : > { %v837_v52 = vmul.f32 %v1862_v48, %v2112_v59 }
 0x1fe   : > { %v839_v53 = vadd.f32 %v838_v49, %v837_v52 }
 0x200   : > { %1865 = vtanh.f32 %v839_v53  ;;  %v2159_v54 = vsel %vm849_vm8, %v839_v53, %v2112_v59 }
 0x202   : > { %v1864_v55 = vpop.eup %1863 }
 0x20d   : > { %v1866_v56 = vpop.eup %1865 }
 0x20e   : > { %v841_v57 = vmul.f32 %v1866_v56, %v1864_v55 }
 0x210   : > { %v2162_v58 = vsel %vm849_vm8, %v841_v57, %v2115_v63  ;;  %v1575_v57 = vld [vmem:[%s2006_s14 + $0x78] sm:$0xff] }
 0x211   : > { %v852_v60 = vpack.c.bf16 %v2162_v58, %v2162_v58 }
 0x213   : > { %1720 = vmatmul.mubr.msk.bf16.vlgmr.msra.gmra.mxu0 %vm408_vm2, %v852_v60  ;;  %1728 = vmatmul.mubr.msk.bf16.vlgmr.msra.gmra.mxu1 %vm408_vm2, %v852_v60 }
 0x214   : > { %1732 = vmatpush3.bf16.msra.mxu0 %v2050_v9  ;;  %1740 = vmatpush3.bf16.msra.mxu1 %v2058_v11 }
 0x215   : > { %1733 = vmatprep.subr.bf16.mxu0 %v1928_v2  ;;  %1741 = vmatprep.subr.bf16.mxu1 %v1928_v2 }
 0x216   : > { %1735 = vmatprep.mubr.msk.bf16.mxu0 %vm1929_vm1, %v1928_v2  ;;  %1743 = vmatprep.mubr.msk.bf16.mxu1 %vm1929_vm1, %v1928_v2 }
 0x218   : > { %1734 = vmatpush3.bf16.msra.mxu0 %v2073_v14  ;;  %1742 = vmatpush3.bf16.msra.mxu1 %v2081_v16 }
 0x219   : > { %1747 = vmatprep.subr.bf16.mxu0 %v1928_v2  ;;  %1755 = vmatprep.subr.bf16.mxu1 %v1928_v2 }
 0x21b   : > { %1736 = vmatmul.mubr.msk.bf16.vlgmr.msra.gmra.mxu0 %vm408_vm2, %v852_v60  ;;  %1744 = vmatmul.mubr.msk.bf16.vlgmr.msra.gmra.mxu1 %vm408_vm2, %v852_v60 }
 0x21c   : > { %1748 = vmatpush3.bf16.msra.mxu0 %v2012_v1  ;;  %1756 = vmatpush3.bf16.msra.mxu1 %v2019_v3  ;;  %v1561_v1 = vld [vmem:[%s2006_s14 + $0x40] sm:$0xff]  ;;  %v1562_v3 = vld [vmem:[%s2006_s14 + $0x48] sm:$0xff] }
 0x21d   : > { %1749 = vmatprep.subr.bf16.mxu0 %v1928_v2  ;;  %1757 = vmatprep.subr.bf16.mxu1 %v1928_v2 }
 0x21e   : > { %1751 = vmatprep.mubr.msk.bf16.mxu0 %vm1929_vm1, %v1928_v2  ;;  %1759 = vmatprep.mubr.msk.bf16.mxu1 %vm1929_vm1, %v1928_v2 }
 0x220   : > { %1750 = vmatpush3.bf16.msra.mxu0 %v2025_v4  ;;  %1758 = vmatpush3.bf16.msra.mxu1 %v2034_v5 }
 0x221   : > { %1763 = vmatprep.subr.bf16.mxu0 %v1928_v2  ;;  %1771 = vmatprep.subr.bf16.mxu1 %v1928_v2 }
 0x2d3   : > { %v895_v59 = vpop.f32.mrf.mxu0  ;;  %v942_v61 = vpop.f32.mrf.mxu1 }
 0x2d4   : > { %v901_v62 = vadd.f32 %v1561_v1, %v895_v59  ;;  %v948_v63 = vadd.f32 %v1562_v3, %v942_v61 }
 0x2d5   : > { %v1721_v0 = vpop.f32.mrf.mxu0  ;;  %v1729_v6 = vpop.f32.mrf.mxu1 }
 0x2d6   : > { %v1566_v7 = vmul.f32 -1.442695, %v901_v62  ;;  %v1568_v10 = vmul.f32 -1.442695, %v948_v63  ;;  %v1574_v62 = vld [vmem:[%s2006_s14 + $0x70] sm:$0xff] }
 0x2d7   : > { %v898_v13 = vpop.f32.mrf.mxu0  ;;  %v945_v4 = vpop.f32.mrf.mxu1 }
 0x2d8   : > { %1867 = vpow2.f32 %v1566_v7 }
 0x2d9   : > { %1869 = vpow2.f32 %v1568_v10  ;;  %v1722_v5 = vpop.f32.mrf.mxu0  ;;  %v1730_v15 = vpop.f32.mrf.mxu1 }
 0x2db   : > { %v989_v17 = vpop.f32.mrf.mxu0  ;;  %v1031_v19 = vpop.f32.mrf.mxu1 }
 0x2dc   : > { %v1037_v22 = vadd.f32 %v1564_v18, %v1031_v19  ;;  %v995_v28 = vadd.f32 %v1563_v25, %v989_v17 }
 0x2dd   : > { %v1737_v20 = vpop.f32.mrf.mxu0  ;;  %v1745_v21 = vpop.f32.mrf.mxu1 }
 0x2de   : > { %v1571_v27 = vmul.f32 -1.442695, %v1037_v22  ;;  %v1262_v22 = vpop.permute.xlu1 %1261 }
 0x2df   : > { %v992_v23 = vpop.f32.mrf.mxu0  ;;  %v1034_v24 = vpop.f32.mrf.mxu1  ;;  %vm1263_vm10 = vcmp.eq.s32.totalorder %v1262_v22, 1 }
 0x2e0   : > { %1871 = vpow2.f32 %v1571_v27 }
 0x2e1   : > { %v1738_v26 = vpop.f32.mrf.mxu0  ;;  %v1746_v12 = vpop.f32.mrf.mxu1  ;;  %1873 = vtanh.f32 %v995_v28 }
 0x2e5   : > { %v1868_v8 = vpop.eup %1867 }
 0x2e6   : > { %v1870_v29 = vpop.eup %1869  ;;  %v905_v30 = vadd.f32 1.0, %v1868_v8 }
 0x2e7   : > { %v952_v31 = vadd.f32 1.0, %v1870_v29 }
 0x2e8   : > { %1875 = vrcp.f32 %v905_v30 }
 0x2e9   : > { %1877 = vrcp.f32 %v952_v31 }
 0x2ed   : > { %v1872_v32 = vpop.eup %1871 }
 0x2ee   : > { %v1874_v33 = vpop.eup %1873  ;;  %v1041_v37 = vadd.f32 1.0, %v1872_v32 }
 0x2f0   : > { %1879 = vrcp.f32 %v1041_v37 }
 0x2f5   : > { %v1876_v34 = vpop.eup %1875 }
 0x2f6   : > { %v1878_v36 = vpop.eup %1877  ;;  %v1045_v38 = vmul.f32 %v1876_v34, %v1874_v33 }
 0x2f7   : > { %v1044_v39 = vmul.f32 %v1878_v36, %v2159_v54 }
 0x2f9   : > { %v1046_v40 = vadd.f32 %v1045_v38, %v1044_v39 }
 0x2fb   : > { %1881 = vtanh.f32 %v1046_v40  ;;  %v2200_v41 = vsel %vm1056_vm9, %v1046_v40, %v2159_v54 }
 0x2fd   : > { %v1880_v42 = vpop.eup %1879 }
 0x308   : > { %v1882_v43 = vpop.eup %1881 }
 0x309   : > { %v1048_v44 = vmul.f32 %v1882_v43, %v1880_v42 }
 0x30b   : > { %v2203_v45 = vsel %vm1056_vm9, %v1048_v44, %v2162_v58 }
 0x30c   : > { %v1059_v46 = vpack.c.bf16 %v2203_v45, %v2203_v45 }
 0x30e   : > { %1752 = vmatmul.mubr.msk.bf16.vlgmr.msra.gmra.mxu0 %vm408_vm2, %v1059_v46  ;;  %1760 = vmatmul.mubr.msk.bf16.vlgmr.msra.gmra.mxu1 %vm408_vm2, %v1059_v46 }
 0x30f   : > { %1764 = vmatpush3.bf16.msra.mxu0 %v2050_v9  ;;  %1772 = vmatpush3.bf16.msra.mxu1 %v2058_v11  ;;  %v1572_v9 = vld [vmem:[%s2006_s14 + $0x60] sm:$0xff]  ;;  %v1573_v11 = vld [vmem:[%s2006_s14 + $0x68] sm:$0xff] }
 0x310   : > { %1765 = vmatprep.subr.bf16.mxu0 %v1928_v2  ;;  %1773 = vmatprep.subr.bf16.mxu1 %v1928_v2 }
 0x311   : > { %1767 = vmatprep.mubr.msk.bf16.mxu0 %vm1929_vm1, %v1928_v2  ;;  %1775 = vmatprep.mubr.msk.bf16.mxu1 %vm1929_vm1, %v1928_v2 }
 0x313   : > { %1766 = vmatpush3.bf16.msra.mxu0 %v2073_v14  ;;  %1774 = vmatpush3.bf16.msra.mxu1 %v2081_v16 }
 0x316   : > { %1768 = vmatmul.mubr.msk.bf16.vlgmr.msra.gmra.mxu0 %vm408_vm2, %v1059_v46  ;;  %1776 = vmatmul.mubr.msk.bf16.vlgmr.msra.gmra.mxu1 %vm408_vm2, %v1059_v46 }
 0x3ce   : > { %v1102_v47 = vpop.f32.mrf.mxu0  ;;  %v1149_v48 = vpop.f32.mrf.mxu1 }
 0x3cf   : > { %v1108_v49 = vadd.f32 %v1572_v9, %v1102_v47  ;;  %v1155_v50 = vadd.f32 %v1573_v11, %v1149_v48 }
 0x3d0   : > { %v1753_v51 = vpop.f32.mrf.mxu0  ;;  %v1761_v52 = vpop.f32.mrf.mxu1 }
 0x3d1   : > { %v1577_v53 = vmul.f32 -1.442695, %v1108_v49  ;;  %v1579_v2 = vmul.f32 -1.442695, %v1155_v50 }
 0x3d2   : > { %v1105_v54 = vpop.f32.mrf.mxu0  ;;  %v1152_v14 = vpop.f32.mrf.mxu1 }
 0x3d3   : > { %1883 = vpow2.f32 %v1577_v53 }
 0x3d4   : > { %1885 = vpow2.f32 %v1579_v2  ;;  %v1754_v16 = vpop.f32.mrf.mxu0  ;;  %v1762_v55 = vpop.f32.mrf.mxu1 }
 0x3d6   : > { %v1196_v56 = vpop.f32.mrf.mxu0  ;;  %v1238_v58 = vpop.f32.mrf.mxu1 }
 0x3d7   : > { %v1244_v3 = vadd.f32 %v1575_v57, %v1238_v58  ;;  %v1202_v7 = vadd.f32 %v1574_v62, %v1196_v56 }
 0x3d8   : > { %v1769_v60 = vpop.f32.mrf.mxu0  ;;  %v1777_v1 = vpop.f32.mrf.mxu1 }
 0x3d9   : > { %v1582_v6 = vmul.f32 -1.442695, %v1244_v3 }
 0x3da   : > { %v1199_v59 = vpop.f32.mrf.mxu0  ;;  %v1241_v61 = vpop.f32.mrf.mxu1 }
 0x3db   : > { %1887 = vpow2.f32 %v1582_v6 }
 0x3dc   : > { %v1770_v63 = vpop.f32.mrf.mxu0  ;;  %v1778_v0 = vpop.f32.mrf.mxu1  ;;  %1889 = vtanh.f32 %v1202_v7 }
 0x3e0   : > { %v1884_v10 = vpop.eup %1883 }
 0x3e1   : > { %v1886_v13 = vpop.eup %1885  ;;  %v1112_v4 = vadd.f32 1.0, %v1884_v10 }
 0x3e2   : > { %v1159_v5 = vadd.f32 1.0, %v1886_v13 }
 0x3e3   : > { %1891 = vrcp.f32 %v1112_v4 }
 0x3e4   : > { %1893 = vrcp.f32 %v1159_v5 }
 0x3e8   : > { %v1888_v15 = vpop.eup %1887 }
 0x3e9   : > { %v1890_v17 = vpop.eup %1889  ;;  %v1248_v21 = vadd.f32 1.0, %v1888_v15 }
 0x3eb   : > { %1895 = vrcp.f32 %v1248_v21 }
 0x3f0   : > { %v1892_v18 = vpop.eup %1891 }
 0x3f1   : > { %v1894_v19 = vpop.eup %1893  ;;  %v1252_v20 = vmul.f32 %v1892_v18, %v1890_v17 }
 0x3f2   : > { %v1251_v23 = vmul.f32 %v1894_v19, %v2200_v41 }
 0x3f4   : > { %v1253_v24 = vadd.f32 %v1252_v20, %v1251_v23 }
 0x3f6   : > { %1897 = vtanh.f32 %v1253_v24  ;;  %v1265_v25 = vsel %vm1263_vm10, %v1253_v24, %v2200_v41 }
 0x3f7   : > { %1267 = vst.msk [vmem:[#allocation3] sm:$0xff] %vm408_vm2, %v1265_v25 }
 0x3f8   : > { %v1896_v26 = vpop.eup %1895 }
 0x403   : > { %v1898_v12 = vpop.eup %1897  ;;  %1271 = sbr.rel (%p1583_p6) target bundleno = 1241 (0x4d9), region = 56 }
 0x404   : > { %v1255_v27 = vmul.f32 %v1898_v12, %v1896_v26 }
 0x406   : > { %v1264_v28 = vsel %vm1263_vm10, %v1255_v27, %v2203_v45 }
 0x407   : > { %1266 = vst.msk [vmem:[#allocation2] sm:$0xff] %vm408_vm2, %v1264_v28 }
 0x408   : > { %v1899_v8 = vld [vmem:[%s2269_s3 + $0x8] sm:$0xff]   ;;  %v1931_v29 = vmov 0.0   ;;  %v1901_v31 = vld [vmem:[%s2269_s3] sm:$0xff]   ;;  %vm1932_vm11 = vmmov 0   ;;  %v1272_v33 = vpack.c.bf16 %v1264_v28, %v1264_v28  ;;  %vm1339_vm12 = vcmask 23552  }
 0x409   : > { %1779 = vmatprep.subr.bf16.mxu0 %v1931_v29  ;;  %1787 = vmatprep.subr.bf16.mxu1 %v1931_v29  ;;  %v1900_v30 = vld [vmem:[%s2271_s5 + $0x8] sm:$0xff]   ;;  %v1902_v32 = vld [vmem:[%s2271_s5] sm:$0xff]  }
 0x40a   : > { %1780 = vmatpush3.bf16.msra.mxu0 %v1899_v8  ;;  %1783 = vmatprep.mubr.msk.bf16.mxu0 %vm1932_vm11, %v1931_v29  ;;  %v1584_v34 = vld [vmem:[%s2270_s4] ss:$0 sm:$0xff] }
 0x40b   : > { %1788 = vmatpush3.bf16.msra.mxu1 %v1900_v30  ;;  %1781 = vmatprep.subr.bf16.mxu0 %v1931_v29  ;;  %v1588_v35 = vld [vmem:[%s2272_s6] ss:$0 sm:$0xff] }
 0x40c   : > { %1789 = vmatprep.subr.bf16.mxu1 %v1931_v29  ;;  %1791 = vmatprep.mubr.msk.bf16.mxu1 %vm1932_vm11, %v1931_v29 }
 0x40e   : > { %1782 = vmatpush3.bf16.msra.mxu0 %v1901_v31 }
 0x40f   : > { %1790 = vmatpush3.bf16.msra.mxu1 %v1902_v32 }
 0x411   : > { %1784 = vmatmul.mubr.msk.bf16.vlgmr.msra.gmra.mxu0 %vm408_vm2, %v1272_v33 }
 0x412   : > { %1792 = vmatmul.mubr.msk.bf16.vlgmr.msra.gmra.mxu1 %vm408_vm2, %v1272_v33 }
 0x4d1   : > { %v1333_v36 = vpop.f32.mrf.mxu0 }
 0x4d2   : > { %v1334_v37 = vadd.f32 %v1584_v34, %v1333_v36  ;;  %v1398_v38 = vpop.f32.mrf.mxu1 }
 0x4d3   : > { %v1399_v39 = vadd.f32 %v1588_v35, %v1398_v38  ;;  %v1785_v40 = vpop.f32.mrf.mxu0 }
 0x4d4   : > { %1340 = vst.msk [vmem:[%s2273_s7] sm:$0xff] %vm1339_vm12, %v1334_v37  ;;  %v1793_v41 = vpop.f32.mrf.mxu1 }
 0x4d5   : > { %1404 = vst.msk [vmem:[%s2274_s8] sm:$0xff] %vm1339_vm12, %v1399_v39  ;;  %v1336_v42 = vpop.f32.mrf.mxu0 }
 0x4d6   : > { %v1401_v43 = vpop.f32.mrf.mxu1 }
 0x4d7   : > { %v1786_v44 = vpop.f32.mrf.mxu0 }
 0x4d8   : > { %v1794_v45 = vpop.f32.mrf.mxu1 }
 0x4d9 PF: > { %s19_s29 = sadd.s32 1, %s1925_s29   ;;  %s2275_s27 = smov %s1921_s28 }
 0x4da   : > { %p16_p7 = scmp.ge.s32.totalorder %s19_s29, 4   ;;  %s2276_s28 = smov %s2278_s30 }
 0x4dc   :  { %18 = sbr.rel (!%p16_p7) target bundleno = 2 (0x2), region = 107 }

</bundles_post_ra>
